<compile_context>
chip_gen: v7x
topology: tpu7x:2x2x1
jax: 0.10.0
libtpu: 0.0.40
codegen_flags: <defaults>
</compile_context>

<pallas_src>
import jax
import jax.numpy as jnp
from jax import lax
from jax.experimental import pallas as pl
from jax.experimental.pallas import tpu as pltpu


def _gelu_tanh(x):
    # tanh-approx GELU (EUP-friendly)
    c = 0.7978845608028654  # sqrt(2/pi)
    return 0.5 * x * (1.0 + jnp.tanh(c * (x + 0.044715 * x * x * x)))


def _make_fused_kernel(num_layers, n_ff, dim_qk, dim_v, Bc, N, D,
                       layer_segs, ln_g_seg, ln_b_seg, eps=1e-5):
    """Full forward (all transformer blocks + final LayerNorm) for Bc sequences."""
    n_w = 2 + n_ff  # per-layer weight refs: wqkv, wo, then one per FF linear

    def kernel(x_ref, *refs):
        w_refs = refs[:num_layers * n_w]
        bias_ref = refs[-2]          # (1, total_bias) f32, all biases + LN affine
        out_ref = refs[-1]           # (Bc, N*D) lane-dense output block

        def bias(seg):
            o, s = seg
            return bias_ref[:, o:o + s]          # static slice -> (1, s) f32

        # (Bc, N, D) -> (Bc*N, D): leading-dim collapse (layout-preserving).
        x = x_ref[...].astype(jnp.float32).reshape(Bc * N, D)

        for l in range(num_layers):
            segs = layer_segs[l]
            wqkv = w_refs[l * n_w + 0][...]      # (D, 2*dqk+dv) bf16
            wo = w_refs[l * n_w + 1][...]        # (dv, D)       bf16

            # ---- single-head self attention ---------------------------------
            # Fused q|k|v projection over ALL Bc*N rows at once; softmax scale is
            # pre-folded into the q columns of wqkv / bqkv.
            qkv = jnp.dot(x.astype(jnp.bfloat16), wqkv,
                          preferred_element_type=jnp.float32) + bias(segs["qkv"])
            q = qkv[:, :dim_qk].reshape(Bc, N, dim_qk)
            k = qkv[:, dim_qk:2 * dim_qk].reshape(Bc, N, dim_qk)
            v = qkv[:, 2 * dim_qk:].reshape(Bc, N, dim_v)

            # Per-sequence scores via batched dot_general (no .T / transpose).
            s = jnp.einsum("bnd,bmd->bnm",
                           q.astype(jnp.bfloat16), k.astype(jnp.bfloat16),
                           preferred_element_type=jnp.float32)       # (Bc, N, N)
            s = s - jnp.max(s, axis=-1, keepdims=True)
            p_att = jnp.exp(s)
            p_att = p_att * pl.reciprocal(
                jnp.sum(p_att, axis=-1, keepdims=True), approx=True)

            attn = jnp.einsum("bnm,bmd->bnd",
                              p_att.astype(jnp.bfloat16), v.astype(jnp.bfloat16),
                              preferred_element_type=jnp.float32)    # (Bc, N, dv)
            attn = attn.reshape(Bc * N, dim_v)
            attn = jnp.dot(attn.astype(jnp.bfloat16), wo,
                           preferred_element_type=jnp.float32) + bias(segs["o"])
            x = attn + x                                             # residual (f32)

            # ---- feed-forward ------------------------------------------------
            h = x
            for li in range(n_ff):
                w = w_refs[l * n_w + 2 + li][...]
                h = jnp.dot(h.astype(jnp.bfloat16), w,
                            preferred_element_type=jnp.float32) + bias(segs["ff"][li])
                if li < n_ff - 1:
                    h = _gelu_tanh(h)
            x = h + x                                                # residual (f32)

        # ---- final LayerNorm (eps=1e-5, affine), stats in f32 ----------------
        mean = jnp.mean(x, axis=-1, keepdims=True)
        xc = x - mean
        var = jnp.mean(xc * xc, axis=-1, keepdims=True)
        inv = lax.rsqrt(var + eps)
        y = xc * inv * bias(ln_g_seg) + bias(ln_b_seg)               # (Bc*N, D)

        # ---- lane-dense epilogue: (Bc*N, D) -> (Bc, N*D) ---------------------
        rows = []
        for b in range(Bc):
            segs_out = [y[r:r + 1, :] for r in range(b * N, (b + 1) * N)]
            rows.append(jnp.concatenate(segs_out, axis=1))           # (1, N*D)
        out_ref[...] = jnp.concatenate(rows, axis=0).astype(out_ref.dtype)

    return kernel


def transformer_layer_general(x, layer_params, ln_gamma, ln_beta, dim_qk, dim_v,
                              batch_chunks=None):
    """x: (B, N, D); layer_params: list of dicts with attention + FF (w, b) pairs."""
    B, N, D = x.shape
    num_layers = len(layer_params)
    n_ff = len(layer_params[0]["ff"])
    scale = float(dim_qk) ** -0.5

    # ---- batch chunking: 1 fully-batched step on single-TC chips (v5e/v6e),
    #      2 "parallel" steps of B/2 sequences on dual-TC chips (v7x). ----------
    if batch_chunks is None:
        try:
            kind = jax.devices()[0].device_kind.lower()
        except Exception:
            kind = ""
        batch_chunks = 2 if ("v7" in kind or "7x" in kind) else 1
    batch_chunks = max(1, min(int(batch_chunks), B))
    while B % batch_chunks:
        batch_chunks -= 1
    Bc = B // batch_chunks

    # ---- pack weights (bf16, one ref each) and ALL biases into one f32 slab ---
    flat_w = []
    bias_parts = []
    _off = [0]

    def add_bias(b):
        b = jnp.reshape(b, (1, -1)).astype(jnp.float32)
        seg = (_off[0], b.shape[1])
        bias_parts.append(b)
        _off[0] += b.shape[1]
        return seg

    layer_segs = []
    for p in layer_params:
        assert len(p["ff"]) == n_ff, "all blocks must share the same FF stack"
        assert p["ff"][0][0].shape[0] == D and p["ff"][-1][0].shape[1] == D, (
            "mlp_layer_widths must start and end at dim_in")

        # Fused q|k|v projection; softmax scale folded into q columns.
        wqkv = jnp.concatenate([p["wq"] * scale, p["wk"], p["wv"]],
                               axis=1).astype(jnp.bfloat16)
        flat_w.append(wqkv)
        segs = {"qkv": add_bias(jnp.concatenate(
            [p["bq"] * scale, p["bk"], p["bv"]], axis=1))}
        flat_w.append(p["wo"].astype(jnp.bfloat16))
        segs["o"] = add_bias(p["bo"])
        ff_segs = []
        for (w, b) in p["ff"]:
            flat_w.append(w.astype(jnp.bfloat16))
            ff_segs.append(add_bias(b))
        segs["ff"] = ff_segs
        layer_segs.append(segs)

    ln_g_seg = add_bias(ln_gamma)
    ln_b_seg = add_bias(ln_beta)
    bias_slab = jnp.concatenate(bias_parts, axis=1)      # (1, total) f32

    kernel = _make_fused_kernel(num_layers, n_ff, dim_qk, dim_v, Bc, N, D,
                                layer_segs, ln_g_seg, ln_b_seg)

    # Weights + bias slab: whole-array resident in VMEM (no double buffering).
    resident = pl.BlockSpec(memory_space=pltpu.MemorySpace.VMEM)
    weight_specs = [resident for _ in flat_w] + [resident]

    out = pl.pallas_call(
        kernel,
        out_shape=jax.ShapeDtypeStruct((batch_chunks, Bc, N * D), x.dtype),
        grid=(batch_chunks,),
        in_specs=[pl.BlockSpec((Bc, N, D), lambda c: (c, 0, 0))] + weight_specs,
        out_specs=pl.BlockSpec((pl.Squeezed(), Bc, N * D), lambda c: (c, 0, 0)),
        compiler_params=pltpu.CompilerParams(
            dimension_semantics=("parallel",)),           # shards chunks over TCs
    )(x, *flat_w, bias_slab)

    return out.reshape(B, N, D)


def _reference(x, layer_params, ln_gamma, ln_beta, dim_qk):
    """Pure-JAX f32 reference (mirrors the PyTorch module in eval mode)."""
    scale = float(dim_qk) ** -0.5
    for p in layer_params:
        q = x @ p["wq"] + p["bq"]
        k = x @ p["wk"] + p["bk"]
        v = x @ p["wv"] + p["bv"]
        s = jnp.einsum("bnd,bmd->bnm", q, k) * scale
        a = jax.nn.softmax(s, axis=-1)
        attn = jnp.einsum("bnm,bmd->bnd", a, v) @ p["wo"] + p["bo"]
        x = attn + x
        h = x
        for li, (w, b) in enumerate(p["ff"]):
            h = h @ w + b
            if li < len(p["ff"]) - 1:
                h = _gelu_tanh(h)
        x = h + x
    mean = jnp.mean(x, axis=-1, keepdims=True)
    var = jnp.mean((x - mean) ** 2, axis=-1, keepdims=True)
    return (x - mean) / jnp.sqrt(var + 1e-5) * ln_gamma + ln_beta


def init_params(key, dim_in, dim_qk, dim_v, attention_depth, mlp_layer_widths):
    layer_params = []
    for _ in range(attention_depth):
        keys = jax.random.split(key, 7)
        key = keys[0]

        def lin(k, din, dout, scale=0.02):
            kw, kb = jax.random.split(k)
            w = (scale * jax.random.normal(kw, (din, dout))).astype(jnp.float32)
            b = (scale * jax.random.normal(kb, (1, dout))).astype(jnp.float32)
            return w, b

        wq, bq = lin(keys[1], dim_in, dim_qk)
        wk, bk = lin(keys[2], dim_in, dim_qk)
        wv, bv = lin(keys[3], dim_in, dim_v)
        wo, bo = lin(keys[4], dim_v, dim_in)

        ff = []
        kff = keys[5]
        for li in range(len(mlp_layer_widths) - 1):
            kff, ksub = jax.random.split(kff)
            ff.append(lin(ksub, mlp_layer_widths[li], mlp_layer_widths[li + 1]))

        layer_params.append(dict(wq=wq, bq=bq, wk=wk, bk=bk, wv=wv, bv=bv,
                                 wo=wo, bo=bo, ff=ff))

    # final nn.LayerNorm(dim_in): default init weight=1, bias=0
    ln_gamma = jnp.ones((1, dim_in), jnp.float32)
    ln_beta = jnp.zeros((1, dim_in), jnp.float32)
    return layer_params, ln_gamma, ln_beta


if __name__ == "__main__":
    # small config consistent with the module
    B, N = 2, 8
    dim_in, dim_qk, dim_v = 32, 16, 16
    attention_depth = 2
    mlp_layer_widths = [dim_in, 64, dim_in]   # must start/end at dim_in for residual

    key = jax.random.PRNGKey(0)
    kx, kp = jax.random.split(key)
    x = jax.random.normal(kx, (B, N, dim_in), dtype=jnp.float32)

    layer_params, ln_gamma, ln_beta = init_params(
        kp, dim_in, dim_qk, dim_v, attention_depth, mlp_layer_widths)

    out = transformer_layer_general(x, layer_params, ln_gamma, ln_beta,
                                    dim_qk, dim_v)
    out = jax.block_until_ready(out)

    assert out.shape == (B, N, dim_in)
    assert bool(jnp.all(jnp.isfinite(out)))
    ref = _reference(x, layer_params, ln_gamma, ln_beta, dim_qk)
    # bf16 MXU inputs with f32 accumulation + approx softmax reciprocal
    # -> loose tolerance vs. the f32 reference.
    assert bool(jnp.all(jnp.abs(out - ref) < 5e-2))
    print("KERNEL_OK")
</pallas_src>

<mosaic_0001>
module attributes {stable_mosaic.version = 11 : i64} {
  func.func @kernel(%arg0: i32, %arg1: memref<2x8x32xf32, #tpu.memory_space<vmem>>, %arg2: memref<32x48xbf16, #tpu.memory_space<vmem>>, %arg3: memref<16x32xbf16, #tpu.memory_space<vmem>>, %arg4: memref<32x64xbf16, #tpu.memory_space<vmem>>, %arg5: memref<64x32xbf16, #tpu.memory_space<vmem>>, %arg6: memref<32x48xbf16, #tpu.memory_space<vmem>>, %arg7: memref<16x32xbf16, #tpu.memory_space<vmem>>, %arg8: memref<32x64xbf16, #tpu.memory_space<vmem>>, %arg9: memref<64x32xbf16, #tpu.memory_space<vmem>>, %arg10: memref<1x416xf32, #tpu.memory_space<vmem>>, %arg11: memref<1x2x256xf32, #tpu.memory_space<vmem>>) attributes {dimension_semantics = [#tpu.dimension_semantics<parallel>], iteration_bounds = array<i64: 1>, scalar_prefetch = 0 : i64, scratch_operands = 0 : i64, tpu.core_type = #tpu.core_type<tc>, window_params = [{transform_indices = @transform_0, window_bounds = array<i64: 2, 8, 32>}, {pipeline_mode = #tpu.pipeline_mode<synchronous>, transform_indices = @transform_1, window_bounds = array<i64: 32, 48>}, {pipeline_mode = #tpu.pipeline_mode<synchronous>, transform_indices = @transform_2, window_bounds = array<i64: 16, 32>}, {pipeline_mode = #tpu.pipeline_mode<synchronous>, transform_indices = @transform_3, window_bounds = array<i64: 32, 64>}, {pipeline_mode = #tpu.pipeline_mode<synchronous>, transform_indices = @transform_4, window_bounds = array<i64: 64, 32>}, {pipeline_mode = #tpu.pipeline_mode<synchronous>, transform_indices = @transform_5, window_bounds = array<i64: 32, 48>}, {pipeline_mode = #tpu.pipeline_mode<synchronous>, transform_indices = @transform_6, window_bounds = array<i64: 16, 32>}, {pipeline_mode = #tpu.pipeline_mode<synchronous>, transform_indices = @transform_7, window_bounds = array<i64: 32, 64>}, {pipeline_mode = #tpu.pipeline_mode<synchronous>, transform_indices = @transform_8, window_bounds = array<i64: 64, 32>}, {pipeline_mode = #tpu.pipeline_mode<synchronous>, transform_indices = @transform_9, window_bounds = array<i64: 1, 416>}, {transform_indices = @transform_10, window_bounds = array<i64: 1, 2, 256>}]} {
    %c0 = arith.constant 0 : index
    %c0_0 = arith.constant 0 : index
    %c0_1 = arith.constant 0 : index
    %0 = vector.load %arg1[%c0, %c0_0, %c0_1] : memref<2x8x32xf32, #tpu.memory_space<vmem>>, vector<2x8x32xf32>
    %1 = vector.shape_cast %0 : vector<2x8x32xf32> to vector<16x32xf32>
    %c0_2 = arith.constant 0 : index
    %c0_3 = arith.constant 0 : index
    %2 = vector.load %arg2[%c0_2, %c0_3] : memref<32x48xbf16, #tpu.memory_space<vmem>>, vector<32x48xbf16>
    %c0_4 = arith.constant 0 : index
    %c0_5 = arith.constant 0 : index
    %3 = vector.load %arg3[%c0_4, %c0_5] : memref<16x32xbf16, #tpu.memory_space<vmem>>, vector<16x32xbf16>
    %4 = arith.truncf %1 : vector<16x32xf32> to vector<16x32xbf16>
    %cst = arith.constant dense<0.000000e+00> : vector<16x48xf32>
    %5 = tpu.matmul %4, %2, %cst {dimension_numbers = #tpu.dot_dimension_numbers<[1], [0], [0], [1], [0, 0, 1, 1], [], []>} : vector<16x32xbf16>, vector<32x48xbf16>, vector<16x48xf32> -> vector<16x48xf32>
    %c0_6 = arith.constant 0 : index
    %c0_7 = arith.constant 0 : index
    %6 = vector.load %arg10[%c0_6, %c0_7] : memref<1x416xf32, #tpu.memory_space<vmem>>, vector<1x48xf32>
    %7 = vector.broadcast %6 : vector<1x48xf32> to vector<16x48xf32>
    %8 = arith.addf %5, %7 : vector<16x48xf32>
    %9 = vector.extract_strided_slice %8 {offsets = [0, 0], sizes = [16, 16], strides = [1, 1]} : vector<16x48xf32> to vector<16x16xf32>
    %10 = vector.shape_cast %9 : vector<16x16xf32> to vector<2x8x16xf32>
    %11 = vector.extract_strided_slice %8 {offsets = [0, 16], sizes = [16, 16], strides = [1, 1]} : vector<16x48xf32> to vector<16x16xf32>
    %12 = vector.shape_cast %11 : vector<16x16xf32> to vector<2x8x16xf32>
    %13 = vector.extract_strided_slice %8 {offsets = [0, 32], sizes = [16, 16], strides = [1, 1]} : vector<16x48xf32> to vector<16x16xf32>
    %14 = vector.shape_cast %13 : vector<16x16xf32> to vector<2x8x16xf32>
    %15 = arith.truncf %10 : vector<2x8x16xf32> to vector<2x8x16xbf16>
    %16 = arith.truncf %12 : vector<2x8x16xf32> to vector<2x8x16xbf16>
    "tpu.trace_start"() <{level = 10 : i32, message = "bnd,bmd->bnm"}> : () -> ()
    %cst_8 = arith.constant dense<0.000000e+00> : vector<2x8x8xf32>
    %17 = tpu.matmul %15, %16, %cst_8 {dimension_numbers = #tpu.dot_dimension_numbers<[2], [2], [1], [1], [0, 0, 0, 1, 1, 1], [0], [0]>} : vector<2x8x16xbf16>, vector<2x8x16xbf16>, vector<2x8x8xf32> -> vector<2x8x8xf32>
    "tpu.trace_stop"() : () -> ()
    %cst_9 = arith.constant dense<0xFF800000> : vector<2x8xf32>
    %18 = vector.multi_reduction <maximumf>, %17, %cst_9 [2] : vector<2x8x8xf32> to vector<2x8xf32>
    %19 = vector.shape_cast %18 : vector<2x8xf32> to vector<2x8x1xf32>
    %20 = vector.broadcast %19 : vector<2x8x1xf32> to vector<2x8x8xf32>
    %21 = arith.subf %17, %20 : vector<2x8x8xf32>
    %22 = math.exp %21 : vector<2x8x8xf32>
    %cst_10 = arith.constant dense<0.000000e+00> : vector<2x8xf32>
    %23 = vector.multi_reduction <add>, %22, %cst_10 [2] : vector<2x8x8xf32> to vector<2x8xf32>
    %24 = vector.shape_cast %23 : vector<2x8xf32> to vector<2x8x1xf32>
    %25 = tpu.reciprocal %24 {approx = true} : vector<2x8x1xf32> -> vector<2x8x1xf32>
    %26 = vector.broadcast %25 : vector<2x8x1xf32> to vector<2x8x8xf32>
    %27 = arith.mulf %22, %26 : vector<2x8x8xf32>
    %28 = arith.truncf %27 : vector<2x8x8xf32> to vector<2x8x8xbf16>
    %29 = arith.truncf %14 : vector<2x8x16xf32> to vector<2x8x16xbf16>
    "tpu.trace_start"() <{level = 10 : i32, message = "bnm,bmd->bnd"}> : () -> ()
    %cst_11 = arith.constant dense<0.000000e+00> : vector<2x8x16xf32>
    %30 = tpu.matmul %28, %29, %cst_11 {dimension_numbers = #tpu.dot_dimension_numbers<[2], [1], [1], [2], [0, 0, 0, 1, 1, 2], [0], [0]>} : vector<2x8x8xbf16>, vector<2x8x16xbf16>, vector<2x8x16xf32> -> vector<2x8x16xf32>
    "tpu.trace_stop"() : () -> ()
    %31 = vector.shape_cast %30 : vector<2x8x16xf32> to vector<16x16xf32>
    %32 = arith.truncf %31 : vector<16x16xf32> to vector<16x16xbf16>
    %cst_12 = arith.constant dense<0.000000e+00> : vector<16x32xf32>
    %33 = tpu.matmul %32, %3, %cst_12 {dimension_numbers = #tpu.dot_dimension_numbers<[1], [0], [0], [1], [0, 0, 1, 1], [], []>} : vector<16x16xbf16>, vector<16x32xbf16>, vector<16x32xf32> -> vector<16x32xf32>
    %c0_13 = arith.constant 0 : index
    %c48 = arith.constant 48 : index
    %34 = vector.load %arg10[%c0_13, %c48] : memref<1x416xf32, #tpu.memory_space<vmem>>, vector<1x32xf32>
    %35 = vector.broadcast %34 : vector<1x32xf32> to vector<16x32xf32>
    %36 = arith.addf %33, %35 : vector<16x32xf32>
    %37 = arith.addf %36, %1 : vector<16x32xf32>
    %c0_14 = arith.constant 0 : index
    %c0_15 = arith.constant 0 : index
    %38 = vector.load %arg4[%c0_14, %c0_15] : memref<32x64xbf16, #tpu.memory_space<vmem>>, vector<32x64xbf16>
    %39 = arith.truncf %37 : vector<16x32xf32> to vector<16x32xbf16>
    %cst_16 = arith.constant dense<0.000000e+00> : vector<16x64xf32>
    %40 = tpu.matmul %39, %38, %cst_16 {dimension_numbers = #tpu.dot_dimension_numbers<[1], [0], [0], [1], [0, 0, 1, 1], [], []>} : vector<16x32xbf16>, vector<32x64xbf16>, vector<16x64xf32> -> vector<16x64xf32>
    %c0_17 = arith.constant 0 : index
    %c80 = arith.constant 80 : index
    %41 = vector.load %arg10[%c0_17, %c80] : memref<1x416xf32, #tpu.memory_space<vmem>>, vector<1x64xf32>
    %42 = vector.broadcast %41 : vector<1x64xf32> to vector<16x64xf32>
    %43 = arith.addf %40, %42 : vector<16x64xf32>
    %cst_18 = arith.constant 5.000000e-01 : f32
    %44 = vector.broadcast %cst_18 : f32 to vector<16x64xf32>
    %45 = arith.mulf %44, %43 : vector<16x64xf32>
    %cst_19 = arith.constant 4.471500e-02 : f32
    %46 = vector.broadcast %cst_19 : f32 to vector<16x64xf32>
    %47 = arith.mulf %46, %43 : vector<16x64xf32>
    %48 = arith.mulf %47, %43 : vector<16x64xf32>
    %49 = arith.mulf %48, %43 : vector<16x64xf32>
    %50 = arith.addf %43, %49 : vector<16x64xf32>
    %cst_20 = arith.constant 0.797884583 : f32
    %51 = vector.broadcast %cst_20 : f32 to vector<16x64xf32>
    %52 = arith.mulf %51, %50 : vector<16x64xf32>
    %53 = math.tanh %52 : vector<16x64xf32>
    %cst_21 = arith.constant 1.000000e+00 : f32
    %54 = vector.broadcast %cst_21 : f32 to vector<16x64xf32>
    %55 = arith.addf %54, %53 : vector<16x64xf32>
    %56 = arith.mulf %45, %55 : vector<16x64xf32>
    %c0_22 = arith.constant 0 : index
    %c0_23 = arith.constant 0 : index
    %57 = vector.load %arg5[%c0_22, %c0_23] : memref<64x32xbf16, #tpu.memory_space<vmem>>, vector<64x32xbf16>
    %58 = arith.truncf %56 : vector<16x64xf32> to vector<16x64xbf16>
    %cst_24 = arith.constant dense<0.000000e+00> : vector<16x32xf32>
    %59 = tpu.matmul %58, %57, %cst_24 {dimension_numbers = #tpu.dot_dimension_numbers<[1], [0], [0], [1], [0, 0, 1, 1], [], []>} : vector<16x64xbf16>, vector<64x32xbf16>, vector<16x32xf32> -> vector<16x32xf32>
    %c0_25 = arith.constant 0 : index
    %c144 = arith.constant 144 : index
    %60 = vector.load %arg10[%c0_25, %c144] : memref<1x416xf32, #tpu.memory_space<vmem>>, vector<1x32xf32>
    %61 = vector.broadcast %60 : vector<1x32xf32> to vector<16x32xf32>
    %62 = arith.addf %59, %61 : vector<16x32xf32>
    %63 = arith.addf %62, %37 : vector<16x32xf32>
    %c0_26 = arith.constant 0 : index
    %c0_27 = arith.constant 0 : index
    %64 = vector.load %arg6[%c0_26, %c0_27] : memref<32x48xbf16, #tpu.memory_space<vmem>>, vector<32x48xbf16>
    %c0_28 = arith.constant 0 : index
    %c0_29 = arith.constant 0 : index
    %65 = vector.load %arg7[%c0_28, %c0_29] : memref<16x32xbf16, #tpu.memory_space<vmem>>, vector<16x32xbf16>
    %66 = arith.truncf %63 : vector<16x32xf32> to vector<16x32xbf16>
    %cst_30 = arith.constant dense<0.000000e+00> : vector<16x48xf32>
    %67 = tpu.matmul %66, %64, %cst_30 {dimension_numbers = #tpu.dot_dimension_numbers<[1], [0], [0], [1], [0, 0, 1, 1], [], []>} : vector<16x32xbf16>, vector<32x48xbf16>, vector<16x48xf32> -> vector<16x48xf32>
    %c0_31 = arith.constant 0 : index
    %c176 = arith.constant 176 : index
    %68 = vector.load %arg10[%c0_31, %c176] : memref<1x416xf32, #tpu.memory_space<vmem>>, vector<1x48xf32>
    %69 = vector.broadcast %68 : vector<1x48xf32> to vector<16x48xf32>
    %70 = arith.addf %67, %69 : vector<16x48xf32>
    %71 = vector.extract_strided_slice %70 {offsets = [0, 0], sizes = [16, 16], strides = [1, 1]} : vector<16x48xf32> to vector<16x16xf32>
    %72 = vector.shape_cast %71 : vector<16x16xf32> to vector<2x8x16xf32>
    %73 = vector.extract_strided_slice %70 {offsets = [0, 16], sizes = [16, 16], strides = [1, 1]} : vector<16x48xf32> to vector<16x16xf32>
    %74 = vector.shape_cast %73 : vector<16x16xf32> to vector<2x8x16xf32>
    %75 = vector.extract_strided_slice %70 {offsets = [0, 32], sizes = [16, 16], strides = [1, 1]} : vector<16x48xf32> to vector<16x16xf32>
    %76 = vector.shape_cast %75 : vector<16x16xf32> to vector<2x8x16xf32>
    %77 = arith.truncf %72 : vector<2x8x16xf32> to vector<2x8x16xbf16>
    %78 = arith.truncf %74 : vector<2x8x16xf32> to vector<2x8x16xbf16>
    "tpu.trace_start"() <{level = 10 : i32, message = "bnd,bmd->bnm"}> : () -> ()
    %cst_32 = arith.constant dense<0.000000e+00> : vector<2x8x8xf32>
    %79 = tpu.matmul %77, %78, %cst_32 {dimension_numbers = #tpu.dot_dimension_numbers<[2], [2], [1], [1], [0, 0, 0, 1, 1, 1], [0], [0]>} : vector<2x8x16xbf16>, vector<2x8x16xbf16>, vector<2x8x8xf32> -> vector<2x8x8xf32>
    "tpu.trace_stop"() : () -> ()
    %cst_33 = arith.constant dense<0xFF800000> : vector<2x8xf32>
    %80 = vector.multi_reduction <maximumf>, %79, %cst_33 [2] : vector<2x8x8xf32> to vector<2x8xf32>
    %81 = vector.shape_cast %80 : vector<2x8xf32> to vector<2x8x1xf32>
    %82 = vector.broadcast %81 : vector<2x8x1xf32> to vector<2x8x8xf32>
    %83 = arith.subf %79, %82 : vector<2x8x8xf32>
    %84 = math.exp %83 : vector<2x8x8xf32>
    %cst_34 = arith.constant dense<0.000000e+00> : vector<2x8xf32>
    %85 = vector.multi_reduction <add>, %84, %cst_34 [2] : vector<2x8x8xf32> to vector<2x8xf32>
    %86 = vector.shape_cast %85 : vector<2x8xf32> to vector<2x8x1xf32>
    %87 = tpu.reciprocal %86 {approx = true} : vector<2x8x1xf32> -> vector<2x8x1xf32>
    %88 = vector.broadcast %87 : vector<2x8x1xf32> to vector<2x8x8xf32>
    %89 = arith.mulf %84, %88 : vector<2x8x8xf32>
    %90 = arith.truncf %89 : vector<2x8x8xf32> to vector<2x8x8xbf16>
    %91 = arith.truncf %76 : vector<2x8x16xf32> to vector<2x8x16xbf16>
    "tpu.trace_start"() <{level = 10 : i32, message = "bnm,bmd->bnd"}> : () -> ()
    %cst_35 = arith.constant dense<0.000000e+00> : vector<2x8x16xf32>
    %92 = tpu.matmul %90, %91, %cst_35 {dimension_numbers = #tpu.dot_dimension_numbers<[2], [1], [1], [2], [0, 0, 0, 1, 1, 2], [0], [0]>} : vector<2x8x8xbf16>, vector<2x8x16xbf16>, vector<2x8x16xf32> -> vector<2x8x16xf32>
    "tpu.trace_stop"() : () -> ()
    %93 = vector.shape_cast %92 : vector<2x8x16xf32> to vector<16x16xf32>
    %94 = arith.truncf %93 : vector<16x16xf32> to vector<16x16xbf16>
    %cst_36 = arith.constant dense<0.000000e+00> : vector<16x32xf32>
    %95 = tpu.matmul %94, %65, %cst_36 {dimension_numbers = #tpu.dot_dimension_numbers<[1], [0], [0], [1], [0, 0, 1, 1], [], []>} : vector<16x16xbf16>, vector<16x32xbf16>, vector<16x32xf32> -> vector<16x32xf32>
    %c0_37 = arith.constant 0 : index
    %c224 = arith.constant 224 : index
    %96 = vector.load %arg10[%c0_37, %c224] : memref<1x416xf32, #tpu.memory_space<vmem>>, vector<1x32xf32>
    %97 = vector.broadcast %96 : vector<1x32xf32> to vector<16x32xf32>
    %98 = arith.addf %95, %97 : vector<16x32xf32>
    %99 = arith.addf %98, %63 : vector<16x32xf32>
    %c0_38 = arith.constant 0 : index
    %c0_39 = arith.constant 0 : index
    %100 = vector.load %arg8[%c0_38, %c0_39] : memref<32x64xbf16, #tpu.memory_space<vmem>>, vector<32x64xbf16>
    %101 = arith.truncf %99 : vector<16x32xf32> to vector<16x32xbf16>
    %cst_40 = arith.constant dense<0.000000e+00> : vector<16x64xf32>
    %102 = tpu.matmul %101, %100, %cst_40 {dimension_numbers = #tpu.dot_dimension_numbers<[1], [0], [0], [1], [0, 0, 1, 1], [], []>} : vector<16x32xbf16>, vector<32x64xbf16>, vector<16x64xf32> -> vector<16x64xf32>
    %c0_41 = arith.constant 0 : index
    %c256 = arith.constant 256 : index
    %103 = vector.load %arg10[%c0_41, %c256] : memref<1x416xf32, #tpu.memory_space<vmem>>, vector<1x64xf32>
    %104 = vector.broadcast %103 : vector<1x64xf32> to vector<16x64xf32>
    %105 = arith.addf %102, %104 : vector<16x64xf32>
    %cst_42 = arith.constant 5.000000e-01 : f32
    %106 = vector.broadcast %cst_42 : f32 to vector<16x64xf32>
    %107 = arith.mulf %106, %105 : vector<16x64xf32>
    %cst_43 = arith.constant 4.471500e-02 : f32
    %108 = vector.broadcast %cst_43 : f32 to vector<16x64xf32>
    %109 = arith.mulf %108, %105 : vector<16x64xf32>
    %110 = arith.mulf %109, %105 : vector<16x64xf32>
    %111 = arith.mulf %110, %105 : vector<16x64xf32>
    %112 = arith.addf %105, %111 : vector<16x64xf32>
    %cst_44 = arith.constant 0.797884583 : f32
    %113 = vector.broadcast %cst_44 : f32 to vector<16x64xf32>
    %114 = arith.mulf %113, %112 : vector<16x64xf32>
    %115 = math.tanh %114 : vector<16x64xf32>
    %cst_45 = arith.constant 1.000000e+00 : f32
    %116 = vector.broadcast %cst_45 : f32 to vector<16x64xf32>
    %117 = arith.addf %116, %115 : vector<16x64xf32>
    %118 = arith.mulf %107, %117 : vector<16x64xf32>
    %c0_46 = arith.constant 0 : index
    %c0_47 = arith.constant 0 : index
    %119 = vector.load %arg9[%c0_46, %c0_47] : memref<64x32xbf16, #tpu.memory_space<vmem>>, vector<64x32xbf16>
    %120 = arith.truncf %118 : vector<16x64xf32> to vector<16x64xbf16>
    %cst_48 = arith.constant dense<0.000000e+00> : vector<16x32xf32>
    %121 = tpu.matmul %120, %119, %cst_48 {dimension_numbers = #tpu.dot_dimension_numbers<[1], [0], [0], [1], [0, 0, 1, 1], [], []>} : vector<16x64xbf16>, vector<64x32xbf16>, vector<16x32xf32> -> vector<16x32xf32>
    %c0_49 = arith.constant 0 : index
    %c320 = arith.constant 320 : index
    %122 = vector.load %arg10[%c0_49, %c320] : memref<1x416xf32, #tpu.memory_space<vmem>>, vector<1x32xf32>
    %123 = vector.broadcast %122 : vector<1x32xf32> to vector<16x32xf32>
    %124 = arith.addf %121, %123 : vector<16x32xf32>
    %125 = arith.addf %124, %99 : vector<16x32xf32>
    %cst_50 = arith.constant dense<0.000000e+00> : vector<16xf32>
    %126 = vector.multi_reduction <add>, %125, %cst_50 [1] : vector<16x32xf32> to vector<16xf32>
    %127 = vector.shape_cast %126 : vector<16xf32> to vector<16x1xf32>
    %cst_51 = arith.constant 3.200000e+01 : f32
    %128 = vector.broadcast %cst_51 : f32 to vector<16x1xf32>
    %129 = arith.divf %127, %128 : vector<16x1xf32>
    %130 = vector.broadcast %129 : vector<16x1xf32> to vector<16x32xf32>
    %131 = arith.subf %125, %130 : vector<16x32xf32>
    %132 = arith.mulf %131, %131 : vector<16x32xf32>
    %cst_52 = arith.constant dense<0.000000e+00> : vector<16xf32>
    %133 = vector.multi_reduction <add>, %132, %cst_52 [1] : vector<16x32xf32> to vector<16xf32>
    %134 = vector.shape_cast %133 : vector<16xf32> to vector<16x1xf32>
    %cst_53 = arith.constant 3.200000e+01 : f32
    %135 = vector.broadcast %cst_53 : f32 to vector<16x1xf32>
    %136 = arith.divf %134, %135 : vector<16x1xf32>
    %cst_54 = arith.constant 9.99999974E-6 : f32
    %137 = vector.broadcast %cst_54 : f32 to vector<16x1xf32>
    %138 = arith.addf %136, %137 : vector<16x1xf32>
    %139 = math.rsqrt %138 : vector<16x1xf32>
    %140 = vector.broadcast %139 : vector<16x1xf32> to vector<16x32xf32>
    %141 = arith.mulf %131, %140 : vector<16x32xf32>
    %c0_55 = arith.constant 0 : index
    %c352 = arith.constant 352 : index
    %142 = vector.load %arg10[%c0_55, %c352] : memref<1x416xf32, #tpu.memory_space<vmem>>, vector<1x32xf32>
    %143 = vector.broadcast %142 : vector<1x32xf32> to vector<16x32xf32>
    %144 = arith.mulf %141, %143 : vector<16x32xf32>
    %c0_56 = arith.constant 0 : index
    %c384 = arith.constant 384 : index
    %145 = vector.load %arg10[%c0_56, %c384] : memref<1x416xf32, #tpu.memory_space<vmem>>, vector<1x32xf32>
    %146 = vector.broadcast %145 : vector<1x32xf32> to vector<16x32xf32>
    %147 = arith.addf %144, %146 : vector<16x32xf32>
    %148 = vector.extract_strided_slice %147 {offsets = [0, 0], sizes = [1, 32], strides = [1, 1]} : vector<16x32xf32> to vector<1x32xf32>
    %149 = vector.extract_strided_slice %147 {offsets = [1, 0], sizes = [1, 32], strides = [1, 1]} : vector<16x32xf32> to vector<1x32xf32>
    %150 = vector.extract_strided_slice %147 {offsets = [2, 0], sizes = [1, 32], strides = [1, 1]} : vector<16x32xf32> to vector<1x32xf32>
    %151 = vector.extract_strided_slice %147 {offsets = [3, 0], sizes = [1, 32], strides = [1, 1]} : vector<16x32xf32> to vector<1x32xf32>
    %152 = vector.extract_strided_slice %147 {offsets = [4, 0], sizes = [1, 32], strides = [1, 1]} : vector<16x32xf32> to vector<1x32xf32>
    %153 = vector.extract_strided_slice %147 {offsets = [5, 0], sizes = [1, 32], strides = [1, 1]} : vector<16x32xf32> to vector<1x32xf32>
    %154 = vector.extract_strided_slice %147 {offsets = [6, 0], sizes = [1, 32], strides = [1, 1]} : vector<16x32xf32> to vector<1x32xf32>
    %155 = vector.extract_strided_slice %147 {offsets = [7, 0], sizes = [1, 32], strides = [1, 1]} : vector<16x32xf32> to vector<1x32xf32>
    %156 = tpu.concatenate %148, %149, %150, %151, %152, %153, %154, %155 in 1 : vector<1x32xf32>, vector<1x32xf32>, vector<1x32xf32>, vector<1x32xf32>, vector<1x32xf32>, vector<1x32xf32>, vector<1x32xf32>, vector<1x32xf32> -> vector<1x256xf32>
    %157 = vector.extract_strided_slice %147 {offsets = [8, 0], sizes = [1, 32], strides = [1, 1]} : vector<16x32xf32> to vector<1x32xf32>
    %158 = vector.extract_strided_slice %147 {offsets = [9, 0], sizes = [1, 32], strides = [1, 1]} : vector<16x32xf32> to vector<1x32xf32>
    %159 = vector.extract_strided_slice %147 {offsets = [10, 0], sizes = [1, 32], strides = [1, 1]} : vector<16x32xf32> to vector<1x32xf32>
    %160 = vector.extract_strided_slice %147 {offsets = [11, 0], sizes = [1, 32], strides = [1, 1]} : vector<16x32xf32> to vector<1x32xf32>
    %161 = vector.extract_strided_slice %147 {offsets = [12, 0], sizes = [1, 32], strides = [1, 1]} : vector<16x32xf32> to vector<1x32xf32>
    %162 = vector.extract_strided_slice %147 {offsets = [13, 0], sizes = [1, 32], strides = [1, 1]} : vector<16x32xf32> to vector<1x32xf32>
    %163 = vector.extract_strided_slice %147 {offsets = [14, 0], sizes = [1, 32], strides = [1, 1]} : vector<16x32xf32> to vector<1x32xf32>
    %164 = vector.extract_strided_slice %147 {offsets = [15, 0], sizes = [1, 32], strides = [1, 1]} : vector<16x32xf32> to vector<1x32xf32>
    %165 = tpu.concatenate %157, %158, %159, %160, %161, %162, %163, %164 in 1 : vector<1x32xf32>, vector<1x32xf32>, vector<1x32xf32>, vector<1x32xf32>, vector<1x32xf32>, vector<1x32xf32>, vector<1x32xf32>, vector<1x32xf32> -> vector<1x256xf32>
    %166 = tpu.concatenate %156, %165 in 0 : vector<1x256xf32>, vector<1x256xf32> -> vector<2x256xf32>
    %c0_57 = arith.constant 0 : index
    %c0_58 = arith.constant 0 : index
    %c0_59 = arith.constant 0 : index
    %167 = vector.load %arg11[%c0_57, %c0_58, %c0_59] : memref<1x2x256xf32, #tpu.memory_space<vmem>>, vector<1x2x256xf32>
    %168 = vector.shape_cast %167 : vector<1x2x256xf32> to vector<2x256xf32>
    %169 = vector.shape_cast %166 : vector<2x256xf32> to vector<1x2x256xf32>
    tpu.vector_store %arg11[%c0_57, %c0_58, %c0_59], %169 {strides = array<i32>} : memref<1x2x256xf32, #tpu.memory_space<vmem>>, vector<1x2x256xf32>,
    return
  }
  func.func @transform_0(%arg0: i32) -> (i32, i32, i32) {
    %c0_i32 = arith.constant 0 : i32
    %c0_i32_0 = arith.constant 0 : i32
    %c0_i32_1 = arith.constant 0 : i32
    return %arg0, %c0_i32, %c0_i32_0 : i32, i32, i32
  }
  func.func @transform_1(%arg0: i32) -> (i32, i32) {
    %c0_i32 = arith.constant 0 : i32
    %c0_i32_0 = arith.constant 0 : i32
    %c0_i32_1 = arith.constant 0 : i32
    return %c0_i32, %c0_i32_0 : i32, i32
  }
  func.func @transform_2(%arg0: i32) -> (i32, i32) {
    %c0_i32 = arith.constant 0 : i32
    %c0_i32_0 = arith.constant 0 : i32
    %c0_i32_1 = arith.constant 0 : i32
    return %c0_i32, %c0_i32_0 : i32, i32
  }
  func.func @transform_3(%arg0: i32) -> (i32, i32) {
    %c0_i32 = arith.constant 0 : i32
    %c0_i32_0 = arith.constant 0 : i32
    %c0_i32_1 = arith.constant 0 : i32
    return %c0_i32, %c0_i32_0 : i32, i32
  }
  func.func @transform_4(%arg0: i32) -> (i32, i32) {
    %c0_i32 = arith.constant 0 : i32
    %c0_i32_0 = arith.constant 0 : i32
    %c0_i32_1 = arith.constant 0 : i32
    return %c0_i32, %c0_i32_0 : i32, i32
  }
  func.func @transform_5(%arg0: i32) -> (i32, i32) {
    %c0_i32 = arith.constant 0 : i32
    %c0_i32_0 = arith.constant 0 : i32
    %c0_i32_1 = arith.constant 0 : i32
    return %c0_i32, %c0_i32_0 : i32, i32
  }
  func.func @transform_6(%arg0: i32) -> (i32, i32) {
    %c0_i32 = arith.constant 0 : i32
    %c0_i32_0 = arith.constant 0 : i32
    %c0_i32_1 = arith.constant 0 : i32
    return %c0_i32, %c0_i32_0 : i32, i32
  }
  func.func @transform_7(%arg0: i32) -> (i32, i32) {
    %c0_i32 = arith.constant 0 : i32
    %c0_i32_0 = arith.constant 0 : i32
    %c0_i32_1 = arith.constant 0 : i32
    return %c0_i32, %c0_i32_0 : i32, i32
  }
  func.func @transform_8(%arg0: i32) -> (i32, i32) {
    %c0_i32 = arith.constant 0 : i32
    %c0_i32_0 = arith.constant 0 : i32
    %c0_i32_1 = arith.constant 0 : i32
    return %c0_i32, %c0_i32_0 : i32, i32
  }
  func.func @transform_9(%arg0: i32) -> (i32, i32) {
    %c0_i32 = arith.constant 0 : i32
    %c0_i32_0 = arith.constant 0 : i32
    %c0_i32_1 = arith.constant 0 : i32
    return %c0_i32, %c0_i32_0 : i32, i32
  }
  func.func @transform_10(%arg0: i32) -> (i32, i32, i32) {
    %c0_i32 = arith.constant 0 : i32
    %c0_i32_0 = arith.constant 0 : i32
    %c0_i32_1 = arith.constant 0 : i32
    return %arg0, %c0_i32, %c0_i32_0 : i32, i32, i32
  }
}

</mosaic_0001>

<bundles_post_ra>
// kernel: tpu_custom_call.1
= control target key start
LH: loop header
LB: loop body
LE: loop exit
PB: predicated region body
PF: predicated region fallthrough
CT: control target
= control target key end

     0   :  { %15 = vsyncpa [#allocation3], 0  ;;  %s1894_s0 = inlined_call_operand.vmem [shape: f32[2,8,32], index: 0, kind: input, shape index: {}]   ;;  %s1895_s1 = inlined_call_operand.vmem [shape: bf16[32,48], index: 1, kind: input, shape index: {}]   ;;  %s1896_s2 = inlined_call_operand.hbm [shape: bf16[16,32], index: 2, kind: input, shape index: {}]   ;;  %s1897_s3 = inlined_call_operand.vmem [shape: bf16[32,64], index: 3, kind: input, shape index: {}]   ;;  %s1898_s4 = inlined_call_operand.vmem [shape: bf16[64,32], index: 4, kind: input, shape index: {}]   ;;  %s1899_s5 = inlined_call_operand.vmem [shape: bf16[32,48], index: 5, kind: input, shape index: {}]   ;;  %s1900_s6 = inlined_call_operand.vmem [shape: bf16[16,32], index: 6, kind: input, shape index: {}]   ;;  %s1901_s7 = inlined_call_operand.vmem [shape: bf16[32,64], index: 7, kind: input, shape index: {}]   ;;  %s1902_s8 = inlined_call_operand.vmem [shape: bf16[64,32], index: 8, kind: input, shape index: {}]   ;;  %s1903_s9 = inlined_call_operand.vmem [shape: f32[1,416], index: 9, kind: input, shape index: {}]   ;;  %s1904_s10 = inlined_call_operand.hbm [shape: f32[1,2,256], index: 10, kind: output, shape index: {}]  }
   0x1   :  { %16 = vsyncpa [#allocation4], 0  ;;  %s1558_s13 = smov [#allocation2]   ;;  %s1510_s17 = scalar_lea.hbm %s1896_s2, 128 }
   0x2   :  { %s26_s14 = sshll.u32 %s1558_s13, 4  ;;  %p1511_p0 = scmp.ne.s32.totalorder %s1896_s2, %s1510_s17  ;;  %s27_s14 = int_to_ptr.vmem [resolvable:$true] %s26_s14 }
   0x3   :  { %p1514_p1 = scmp.lt.u32.totalorder %s1510_s17, %s1896_s2 }
   0x5   :  { %p1516_p2 = pnand %p1514_p1, %p1511_p0 }
   0x7   :  { %1519 = shalt.err (!%p1516_p2)
}
   0x8   :  { %s1520_s22 = scalar_lea.vmem %s27_s14, 128  ;;  %p1525_p4 = scmp.lt.s32.totalorder %s27_s14, %s27_s14 }
   0x9   :  { %p1521_p3 = scmp.ne.s32.totalorder %s27_s14, %s1520_s22  ;;  %p1526_p5 = scmp.lt.s32.totalorder %s1520_s22, %s1520_s22 }
   0xb   :  { %p1527_p6 = por %p1526_p5, %p1525_p4 }
   0xd   :  { %p1528_p7 = pnand %p1527_p6, %p1521_p3 }
   0xf   :  { %1531 = shalt.err (!%p1528_p7)
}
  0x10   :  { %s1559_s23 = smov 64   ;;  %s1560_s24 = smov 4  }
  0x11   :  { %32 = dma.hbm_to_vmem [thread:$0]  %s1896_s2, 128, %s27_s14, [#allocation3], %s1559_s23, %s1559_s23, %s1560_s24  }
  0x12   :  { %1554 = dma.done.wait [#allocation3], 128  }
  0x13   :  { %1555 = vsyncadd [#allocation3], 4294967168  ;;  %v1561_v0 = vmov 0.0   ;;  %vm1562_vm0 = vmmov 0   ;;  %v1464_v1 = vld [vmem:[%s1895_s1] sm:$0xff]   ;;  %v1465_v2 = vld [vmem:[%s1895_s1 + $0x8] sm:$0xff]   ;;  %v416_v63 = vlaneseq }
  0x14   :  { %1337 = vmatprep.subr.bf16.mxu1 %v1561_v0  ;;  %1341 = vmatprep.mubr.msk.bf16.mxu1 %vm1562_vm0, %v1561_v0  ;;  %v1653_v3 = vld [vmem:[%s1894_s0] sm:$0xff]  ;;  %v1658_v4 = vld [vmem:[%s1894_s0 + $0x8] sm:$0xff]  ;;  %vm79_vm1 = vcmask 261120   ;;  %s1563_s0 = smov 112   ;;  %vm129_vm2 = vcmask 130048   ;;  %vm225_vm3 = vcmask 64512  }
  0x15   :  { %1351 = vmatprep.subr.bf16.mxu0 %v1561_v0  ;;  %1353 = vmatprep.mubr.msk.bf16.mxu0 %vm1562_vm0, %v1561_v0  ;;  %v59_v5 = vpack.c.bf16 %v1658_v4, %v1653_v3  ;;  %v1670_v6 = vld [vmem:[%s1903_s9] ss:$0 sm:$0xff]  ;;  %s1564_s15 = smov 96   ;;  %vm255_vm4 = vcmask 1043456   ;;  %s1565_s16 = smov 80   ;;  %v1468_v62 = vld [vmem:[%s1897_s3 + $0x8] sm:$0xff]  }
  0x16   :  { %1338 = vmatpush3.bf16.msra.mxu1 %v1464_v1  ;;  %v1466_v51 = vld [vmem:[#allocation2] sm:$0xff]   ;;  %v417_v1 = vshrl.u32 %v416_v63, 7  ;;  %s1566_s24 = smov 48   ;;  %vm440_vm5 = vcmask 392192   ;;  %vm547_vm6 = vcmask 523264   ;;  %vm1180_vm7 = vcmask 785408  }
  0x17   :  { %1339 = vmatprep.subr.bf16.mxu1 %v1561_v0  ;;  %v1467_v61 = vld [vmem:[%s1897_s3] sm:$0xff]   ;;  %vm1224_vm8 = vcmask 1040384  }
  0x1a   :  { %1340 = vmatpush3.bf16.msra.mxu1 %v1465_v2  ;;  %v414_v2 = vld [vmem:[%s1903_s9] sm:$0x3] }
  0x1b   :  { %1345 = vmatprep.subr.bf16.mxu1 %v1561_v0 }
  0x1d   :  { %1342 = vmatmul.mubr.msk.bf16.vlgmr.msra.gmra.mrb[0].mxu1 %vm79_vm1, %v59_v5  ;;  %v422_v5 = vsub.s32 1, %v417_v1 }
  0x1e   :  { %1347 = vmatprep.mubr.msk.bf16.mxu1 %vm1562_vm0, %v1561_v0 }
  0xf0   :  { %v117_v7 = vpop.f32.mrb[0].mxu1 }
  0xf1   :  { %v118_v8 = vadd.f32 %v1670_v6, %v117_v7  ;;  %v1343_v9 = vpop.f32.mrb[1].mxu1  ;;  %v423_v7 = vrot.slane %v414_v2, %v422_v5 }
  0xf2   :  { %v120_v10 = vpop.f32.mrb[2].mxu1 }
  0xf3   :  { %v124_v11 = vpack.c.bf16 %v118_v8, %v118_v8  ;;  %v121_v12 = vadd.f32 %v1670_v6, %v120_v10  ;;  %v1344_v13 = vpop.f32.mrb[3].mxu1 }
  0xf5   :  { %127 = vrot.lane.b32.xlu0 %v124_v11, %s1563_s0  ;;  %v125_v14 = vpack.c.bf16 %v121_v12, %v121_v12 }
  0xf9   :  { %177 = vrot.lane.b32.xlu0 %v125_v14, %s1563_s0 }
 0x167   :  { %v128_v15 = vpop.permute.xlu0 %127 }
 0x168   :  { %v134_v16 = vsel %vm129_vm2, %v128_v15, 0 }
 0x169   :  { %1346 = vmatpush3.bf16.xpose.msra.mxu1 %v134_v16 }
 0x16a   :  { %1357 = vmatprep.subr.bf16.mxu1 %v1561_v0 }
 0x16b   :  { %v178_v17 = vpop.permute.xlu0 %177 }
 0x16c   :  { %v183_v18 = vsel %vm129_vm2, %v178_v17, 0 }
 0x16d   :  { %1352 = vmatpush3.bf16.xpose.msra.mxu0 %v183_v18 }
 0x16e   :  { %1363 = vmatprep.subr.bf16.mxu0 %v1561_v0 }
 0x170   :  { %1348 = vmatmul.mubr.msk.bf16.vlgmr.msra.gmra.mrb[4].mxu1 %vm129_vm2, %v124_v11 }
 0x171   :  { %1359 = vmatprep.mubr.msk.bf16.mxu1 %vm1562_vm0, %v1561_v0 }
 0x174   :  { %1354 = vmatmul.mubr.msk.bf16.vlgmr.msra.gmra.mrb[0].mxu0 %vm129_vm2, %v125_v14 }
 0x175   :  { %1365 = vmatprep.mubr.msk.bf16.mxu0 %vm1562_vm0, %v1561_v0 }
 0x243   :  { %v170_v19 = vpop.f32.mrb[4].mxu1 }
 0x244   :  { %v1349_v20 = vpop.f32.mrb[5].mxu1  ;;  %v226_v21 = vsel %vm225_vm3, %v170_v19, -inf }
 0x245   :  { %227 = vmax.xlane.f32.xlu1 %v226_v21  ;;  %v173_v22 = vpop.f32.mrb[6].mxu1  ;;  %v1472_v20 = vld [vmem:[%s1898_s4 + $0x18] sm:$0xff]   ;;  %v1749_v21 = vld [vmem:[%s1903_s9 + $0x1] ss:$0 sm:$0xff] }
 0x246   :  { %v1350_v23 = vpop.f32.mrb[7].mxu1 }
 0x247   :  { %v219_v24 = vpop.f32.mrb[0].mxu0 }
 0x248   :  { %v1355_v25 = vpop.f32.mrb[1].mxu0  ;;  %v229_v26 = vsel %vm225_vm3, %v219_v24, -inf }
 0x249   :  { %v222_v27 = vpop.f32.mrb[2].mxu0  ;;  %230 = vmax.xlane.f32.xlu1 %v229_v26 }
 0x24a   :  { %v1356_v28 = vpop.f32.mrb[3].mxu0 }
 0x25a   :  { %250 = vrot.lane.b32.xlu1 %v124_v11, %s1564_s15 }
 0x2d2   :  { %v228_v29 = vpop.xlane.xlu1 %227 }
 0x2d3   :  { %v232_v30 = vsub.f32 %v170_v19, %v228_v29  ;;  %v1469_v19 = vld [vmem:[%s1898_s4] sm:$0xff]  }
 0x2d5   :  { %v234_v31 = vmul.f32 1.442695, %v232_v30 }
 0x2d6   :  { %v231_v32 = vpop.xlane.xlu1 %230 }
 0x2d7   :  { %1482 = vpow2.f32 %v234_v31  ;;  %v233_v33 = vsub.f32 %v219_v24, %v231_v32 }
 0x2d9   :  { %v236_v34 = vmul.f32 1.442695, %v233_v33 }
 0x2da   :  { %v251_v35 = vpop.permute.xlu1 %250 }
 0x2db   :  { %1484 = vpow2.f32 %v236_v34  ;;  %v257_v36 = vsel %vm255_vm4, %v251_v35, 0 }
 0x2dc   :  { %1358 = vmatpush3.bf16.msra.mxu1 %v257_v36 }
 0x2dd   :  { %1369 = vmatprep.subr.bf16.mxu1 %v1561_v0 }
 0x2e1   :  { %v1483_v37 = vpop.eup %1482 }
 0x2e2   :  { %v238_v38 = vsel %vm225_vm3, %v1483_v37, 0.0 }
 0x2e3   :  { %239 = vadd.xlane.f32.xlu0 %v238_v38 }
 0x2e5   :  { %v1485_v39 = vpop.eup %1484 }
 0x2e6   :  { %v241_v40 = vsel %vm225_vm3, %v1485_v39, 0.0 }
 0x2e7   :  { %242 = vadd.xlane.f32.xlu1 %v241_v40 }
 0x2f8   :  { %299 = vrot.lane.b32.xlu1 %v125_v14, %s1564_s15 }
 0x2f9   :  { %438 = vrot.lane.b32.xlu0 %v423_v7, %s1566_s24 }
 0x2fc   :  { %360 = vrot.lane.b32.xlu1 %v1670_v6, %s1565_s16  ;;  %v418_v6 = vsub.s32 0, %v417_v1 }
 0x2fe   :  { %v419_v8 = vrot.slane %v414_v2, %v418_v6 }
 0x300   :  { %436 = vrot.lane.b32.xlu1 %v419_v8, %s1566_s24 }
 0x304   :  { %544 = vrot.lane.b32.xlu1 %v1749_v21, %s1563_s0 }
 0x308   :  { %613 = vrot.lane.b32.xlu1 %v1749_v21, %s1565_s16  ;;  %s1567_s16 = smov 32  }
 0x370   :  { %v240_v41 = vpop.xlane.xlu0 %239 }
 0x371   :  { %1486 = vrcp.f32 %v240_v41 }
 0x374   :  { %v243_v42 = vpop.xlane.xlu1 %242  ;;  %v439_v22 = vpop.permute.xlu0 %438 }
 0x375   :  { %1488 = vrcp.f32 %v243_v42 }
 0x378   :  { %v300_v43 = vpop.permute.xlu1 %299 }
 0x379   :  { %v305_v44 = vsel %vm255_vm4, %v300_v43, 0 }
 0x37a   :  { %1364 = vmatpush3.bf16.msra.mxu0 %v305_v44 }
 0x37b   :  { %v1487_v45 = vpop.eup %1486  ;;  %1375 = vmatprep.subr.bf16.mxu0 %v1561_v0 }
 0x37c   :  { %v246_v46 = vmul.f32 %v1487_v45, %v1483_v37  ;;  %v361_v9 = vpop.permute.xlu1 %360 }
 0x37e   :  { %v248_v47 = vpack.c.bf16 %v246_v46, %v246_v46 }
 0x37f   :  { %v1489_v48 = vpop.eup %1488 }
 0x380   :  { %v247_v49 = vmul.f32 %v1489_v48, %v1485_v39  ;;  %1360 = vmatmul.mubr.msk.bf16.vlgmr.msra.gmra.mrb[8].mxu1 %vm225_vm3, %v248_v47  ;;  %v437_v23 = vpop.permute.xlu1 %436 }
 0x381   :  { %1371 = vmatprep.mubr.msk.bf16.mxu1 %vm1562_vm0, %v1561_v0  ;;  %1370 = vmatpush3.bf16.msra.mxu1 %v1466_v51  ;;  %v441_v24 = vsel %vm440_vm5, %v437_v23, %v439_v22  ;;  %v1474_v51 = vld [vmem:[%s1899_s5 + $0x8] sm:$0xff]  }
 0x382   :  { %v249_v50 = vpack.c.bf16 %v247_v49, %v247_v49  ;;  %1383 = vmatprep.subr.bf16.mxu1 %v1561_v0 }
 0x384   :  { %1366 = vmatmul.mubr.msk.bf16.vlgmr.msra.gmra.mrb[4].mxu0 %vm225_vm3, %v249_v50  ;;  %v1473_v50 = vld [vmem:[%s1899_s5] sm:$0xff]  }
 0x385   :  { %1379 = vmatprep.mubr.msk.bf16.mxu0 %vm1562_vm0, %v1561_v0  ;;  %1376 = vmatpush3.bf16.msra.mxu0 %v1467_v61 }
 0x386   :  { %1377 = vmatprep.subr.bf16.mxu0 %v1561_v0 }
 0x389   :  { %1378 = vmatpush3.bf16.msra.mxu0 %v1468_v62 }
 0x38a   :  { %1395 = vmatprep.subr.bf16.mxu0 %v1561_v0 }
 0x453   :  { %v293_v52 = vpop.f32.mrb[8].mxu1 }
 0x454   :  { %v1361_v53 = vpop.f32.mrb[9].mxu1 }
 0x455   :  { %v296_v54 = vpop.f32.mrb[10].mxu1 }
 0x456   :  { %v1362_v55 = vpop.f32.mrb[11].mxu1 }
 0x457   :  { %v341_v56 = vpop.f32.mrb[4].mxu0 }
 0x458   :  { %v347_v57 = vpack.c.bf16 %v341_v56, %v293_v52  ;;  %v1367_v58 = vpop.f32.mrb[5].mxu0  ;;  %v545_v52 = vpop.permute.xlu1 %544 }
 0x459   :  { %v344_v59 = vpop.f32.mrb[6].mxu0 }
 0x45a   :  { %v1368_v60 = vpop.f32.mrb[7].mxu0  ;;  %1372 = vmatmul.mubr.msk.bf16.vlgmr.msra.gmra.mrb[12].mxu1 %vm129_vm2, %v347_v57 }
 0x45b   :  { %1391 = vmatprep.mubr.msk.bf16.mxu1 %vm1562_vm0, %v1561_v0  ;;  %1384 = vmatpush3.bf16.msra.mxu1 %v1469_v19 }
 0x45c   :  { %1385 = vmatprep.subr.bf16.mxu1 %v1561_v0  ;;  %v614_v62 = vpop.permute.xlu1 %613 }
 0x52d   :  { %v400_v10 = vpop.f32.mrb[12].mxu1 }
 0x52e   :  { %v401_v11 = vadd.f32 %v400_v10, %v361_v9  ;;  %v1373_v12 = vpop.f32.mrb[13].mxu1 }
 0x52f   :  { %v403_v13 = vpop.f32.mrb[14].mxu1 }
 0x530   :  { %v404_v14 = vadd.f32 %v403_v13, %v361_v9  ;;  %v1374_v15 = vpop.f32.mrb[15].mxu1  ;;  %v1720_v16 = vadd.f32 %v401_v11, %v1653_v3  ;;  %v1470_v3 = vld [vmem:[%s1898_s4 + $0x8] sm:$0xff]  }
 0x531   :  { %1386 = vmatpush3.bf16.msra.mxu1 %v1470_v3 }
 0x532   :  { %v1723_v17 = vadd.f32 %v404_v14, %v1658_v4  ;;  %v1471_v4 = vld [vmem:[%s1898_s4 + $0x10] sm:$0xff]   ;;  %1387 = vmatprep.subr.bf16.mxu1 %v1561_v0 }
 0x534   :  { %v413_v18 = vpack.c.bf16 %v1723_v17, %v1720_v16 }
 0x535   :  { %1388 = vmatpush3.bf16.msra.mxu1 %v1471_v4 }
 0x536   :  { %1380 = vmatmul.mubr.msk.bf16.vlgmr.msra.gmra.mrb[8].mxu0 %vm79_vm1, %v413_v18  ;;  %1389 = vmatprep.subr.bf16.mxu1 %v1561_v0 }
 0x537   :  { %1399 = vmatprep.mubr.msk.bf16.mxu0 %vm1562_vm0, %v1561_v0  ;;  %1396 = vmatpush3.bf16.msra.mxu0 %v1473_v50 }
 0x538   :  { %1397 = vmatprep.subr.bf16.mxu0 %v1561_v0 }
 0x539   :  { %1390 = vmatpush3.bf16.msra.mxu1 %v1472_v20 }
 0x53a   :  { %1409 = vmatprep.subr.bf16.mxu1 %v1561_v0 }
 0x53b   :  { %1398 = vmatpush3.bf16.msra.mxu0 %v1474_v51 }
 0x53c   :  { %1403 = vmatprep.subr.bf16.mxu0 %v1561_v0 }
 0x609   :  { %v480_v25 = vpop.f32.mrb[8].mxu0 }
 0x60a   :  { %v481_v26 = vadd.f32 %v480_v25, %v441_v24  ;;  %v1381_v27 = vpop.f32.mrb[9].mxu0 }
 0x60b   :  { %v483_v28 = vpop.f32.mrb[10].mxu0 }
 0x60c   :  { %v489_v29 = vmul.f32 0.044715, %v481_v26  ;;  %v484_v30 = vadd.f32 %v483_v28, %v441_v24  ;;  %v1382_v31 = vpop.f32.mrb[11].mxu0  ;;  %v487_v44 = vmul.f32 0.5, %v481_v26 }
 0x60e   :  { %v491_v32 = vmul.f32 %v489_v29, %v481_v26  ;;  %v490_v33 = vmul.f32 0.044715, %v484_v30  ;;  %v488_v45 = vmul.f32 0.5, %v484_v30 }
 0x610   :  { %v493_v34 = vmul.f32 %v491_v32, %v481_v26  ;;  %v492_v35 = vmul.f32 %v490_v33, %v484_v30 }
 0x612   :  { %v495_v36 = vadd.f32 %v493_v34, %v481_v26  ;;  %v494_v37 = vmul.f32 %v492_v35, %v484_v30 }
 0x614   :  { %v497_v38 = vmul.f32 0.7978846, %v495_v36  ;;  %v496_v39 = vadd.f32 %v494_v37, %v484_v30 }
 0x616   :  { %1490 = vtanh.f32 %v497_v38  ;;  %v498_v40 = vmul.f32 0.7978846, %v496_v39 }
 0x618   :  { %1492 = vtanh.f32 %v498_v40 }
 0x620   :  { %v1491_v41 = vpop.eup %1490 }
 0x621   :  { %v501_v42 = vadd.f32 1.0, %v1491_v41 }
 0x622   :  { %v1493_v43 = vpop.eup %1492 }
 0x623   :  { %v502_v46 = vadd.f32 1.0, %v1493_v43  ;;  %v503_v47 = vmul.f32 %v501_v42, %v487_v44 }
 0x625   :  { %v504_v48 = vmul.f32 %v502_v46, %v488_v45  ;;  %v1475_v45 = vld [vmem:[%s1900_s6] sm:$0xff]  }
 0x627   :  { %v513_v49 = vpack.c.bf16 %v504_v48, %v503_v47 }
 0x629   :  { %1392 = vmatmul.mubr.msk.bf16.vlgmr.msra.gmra.mrb[16].mxu1 %vm547_vm6, %v513_v49 }
 0x62a   :  { %1411 = vmatprep.mubr.msk.bf16.mxu1 %vm1562_vm0, %v1561_v0 }
 0x6fc   :  { %v585_v53 = vpop.f32.mrb[16].mxu1 }
 0x6fd   :  { %v586_v54 = vadd.f32 %v585_v53, %v545_v52  ;;  %v1393_v55 = vpop.f32.mrb[17].mxu1 }
 0x6fe   :  { %v588_v56 = vpop.f32.mrb[18].mxu1  ;;  %v1476_v55 = vld [vmem:[%s1901_s7] sm:$0xff]  }
 0x6ff   :  { %v589_v57 = vadd.f32 %v588_v56, %v545_v52  ;;  %v1394_v58 = vpop.f32.mrb[19].mxu1  ;;  %v1767_v59 = vadd.f32 %v586_v54, %v1720_v16  ;;  %v1824_v56 = vld [vmem:[%s1903_s9 + $0x2] ss:$0 sm:$0xff] }
 0x701   :  { %v1770_v60 = vadd.f32 %v589_v57, %v1723_v17 }
 0x703   :  { %v600_v61 = vpack.c.bf16 %v1770_v60, %v1767_v59 }
 0x705   :  { %1400 = vmatmul.mubr.msk.bf16.vlgmr.msra.gmra.mrb[12].mxu0 %vm79_vm1, %v600_v61 }
 0x706   :  { %1405 = vmatprep.mubr.msk.bf16.mxu0 %vm1562_vm0, %v1561_v0 }
 0x7d8   :  { %v653_v63 = vpop.f32.mrb[12].mxu0 }
 0x7d9   :  { %v654_v1 = vadd.f32 %v653_v63, %v614_v62  ;;  %v1401_v2 = vpop.f32.mrb[13].mxu0 }
 0x7da   :  { %v656_v5 = vpop.f32.mrb[14].mxu0 }
 0x7db   :  { %v660_v6 = vpack.c.bf16 %v654_v1, %v654_v1  ;;  %v657_v7 = vadd.f32 %v656_v5, %v614_v62  ;;  %v1402_v8 = vpop.f32.mrb[15].mxu0 }
 0x7dc   :  { %v1478_v8 = vld [vmem:[%s1902_s8] sm:$0xff]  }
 0x7dd   :  { %663 = vrot.lane.b32.xlu1 %v660_v6, %s1563_s0  ;;  %v661_v9 = vpack.c.bf16 %v657_v7, %v657_v7 }
 0x7e1   :  { %712 = vrot.lane.b32.xlu1 %v661_v9, %s1563_s0 }
 0x84f   :  { %v664_v10 = vpop.permute.xlu1 %663 }
 0x850   :  { %v669_v11 = vsel %vm129_vm2, %v664_v10, 0 }
 0x851   :  { %1404 = vmatpush3.bf16.xpose.msra.mxu0 %v669_v11 }
 0x852   :  { %1415 = vmatprep.subr.bf16.mxu0 %v1561_v0 }
 0x853   :  { %v713_v12 = vpop.permute.xlu1 %712 }
 0x854   :  { %v718_v13 = vsel %vm129_vm2, %v713_v12, 0 }
 0x855   :  { %1410 = vmatpush3.bf16.xpose.msra.mxu1 %v718_v13 }
 0x856   :  { %1421 = vmatprep.subr.bf16.mxu1 %v1561_v0 }
 0x858   :  { %1406 = vmatmul.mubr.msk.bf16.vlgmr.msra.gmra.mrb[16].mxu0 %vm129_vm2, %v660_v6 }
 0x859   :  { %1417 = vmatprep.mubr.msk.bf16.mxu0 %vm1562_vm0, %v1561_v0 }
 0x85c   :  { %1412 = vmatmul.mubr.msk.bf16.vlgmr.msra.gmra.mrb[20].mxu1 %vm129_vm2, %v661_v9 }
 0x85d   :  { %1423 = vmatprep.mubr.msk.bf16.mxu1 %vm1562_vm0, %v1561_v0 }
 0x92b   :  { %v705_v14 = vpop.f32.mrb[16].mxu0 }
 0x92c   :  { %v1407_v15 = vpop.f32.mrb[17].mxu0  ;;  %v760_v16 = vsel %vm225_vm3, %v705_v14, -inf }
 0x92d   :  { %761 = vmax.xlane.f32.xlu1 %v760_v16  ;;  %v708_v17 = vpop.f32.mrb[18].mxu0 }
 0x92e   :  { %v1408_v18 = vpop.f32.mrb[19].mxu0 }
 0x92f   :  { %v754_v19 = vpop.f32.mrb[20].mxu1 }
 0x930   :  { %v1413_v3 = vpop.f32.mrb[21].mxu1  ;;  %v763_v4 = vsel %vm225_vm3, %v754_v19, -inf }
 0x931   :  { %764 = vmax.xlane.f32.xlu0 %v763_v4  ;;  %v757_v20 = vpop.f32.mrb[22].mxu1 }
 0x932   :  { %v1414_v22 = vpop.f32.mrb[23].mxu1 }
 0x9ba   :  { %v762_v23 = vpop.xlane.xlu1 %761 }
 0x9bb   :  { %v766_v24 = vsub.f32 %v705_v14, %v762_v23 }
 0x9bd   :  { %v768_v25 = vmul.f32 1.442695, %v766_v24 }
 0x9be   :  { %v765_v26 = vpop.xlane.xlu0 %764 }
 0x9bf   :  { %1494 = vpow2.f32 %v768_v25  ;;  %v767_v27 = vsub.f32 %v754_v19, %v765_v26 }
 0x9c1   :  { %v770_v28 = vmul.f32 1.442695, %v767_v27 }
 0x9c3   :  { %1496 = vpow2.f32 %v770_v28 }
 0x9c9   :  { %v1495_v29 = vpop.eup %1494 }
 0x9ca   :  { %v772_v30 = vsel %vm225_vm3, %v1495_v29, 0.0 }
 0x9cb   :  { %773 = vadd.xlane.f32.xlu0 %v772_v30 }
 0x9cd   :  { %v1497_v31 = vpop.eup %1496 }
 0x9ce   :  { %v775_v32 = vsel %vm225_vm3, %v1497_v31, 0.0 }
 0x9cf   :  { %776 = vadd.xlane.f32.xlu1 %v775_v32 }
 0x9e0   :  { %832 = vrot.lane.b32.xlu1 %v661_v9, %s1564_s15  ;;  %v1479_v9 = vld [vmem:[%s1902_s8 + $0x8] sm:$0xff]  }
 0x9e1   :  { %784 = vrot.lane.b32.xlu0 %v660_v6, %s1564_s15 }
 0x9e4   :  { %893 = vrot.lane.b32.xlu1 %v1749_v21, %s1567_s16  ;;  %v1477_v21 = vld [vmem:[%s1901_s7 + $0x8] sm:$0xff]  }
 0x9e5   :  { %1061 = vrot.lane.b32.xlu0 %v1824_v56, %s1559_s23 }
 0xa58   :  { %v774_v33 = vpop.xlane.xlu0 %773 }
 0xa59   :  { %1498 = vrcp.f32 %v774_v33 }
 0xa5c   :  { %v777_v34 = vpop.xlane.xlu1 %776  ;;  %v785_v35 = vpop.permute.xlu0 %784 }
 0xa5d   :  { %1500 = vrcp.f32 %v777_v34  ;;  %v790_v36 = vsel %vm255_vm4, %v785_v35, 0 }
 0xa5e   :  { %1416 = vmatpush3.bf16.msra.mxu0 %v790_v36 }
 0xa5f   :  { %1427 = vmatprep.subr.bf16.mxu0 %v1561_v0 }
 0xa60   :  { %v833_v37 = vpop.permute.xlu1 %832  ;;  %v1062_v33 = vpop.permute.xlu0 %1061 }
 0xa61   :  { %v838_v38 = vsel %vm255_vm4, %v833_v37, 0 }
 0xa62   :  { %1422 = vmatpush3.bf16.msra.mxu1 %v838_v38 }
 0xa63   :  { %v1499_v39 = vpop.eup %1498  ;;  %1433 = vmatprep.subr.bf16.mxu1 %v1561_v0 }
 0xa64   :  { %v780_v40 = vmul.f32 %v1499_v39, %v1495_v29  ;;  %v894_v57 = vpop.permute.xlu1 %893 }
 0xa66   :  { %v782_v41 = vpack.c.bf16 %v780_v40, %v780_v40 }
 0xa67   :  { %v1501_v42 = vpop.eup %1500 }
 0xa68   :  { %v781_v43 = vmul.f32 %v1501_v42, %v1497_v31  ;;  %1418 = vmatmul.mubr.msk.bf16.vlgmr.msra.gmra.mrb[20].mxu0 %vm225_vm3, %v782_v41 }
 0xa69   :  { %1429 = vmatprep.mubr.msk.bf16.mxu0 %vm1562_vm0, %v1561_v0  ;;  %1428 = vmatpush3.bf16.msra.mxu0 %v1475_v45 }
 0xa6a   :  { %v783_v44 = vpack.c.bf16 %v781_v43, %v781_v43  ;;  %1441 = vmatprep.subr.bf16.mxu0 %v1561_v0 }
 0xa6c   :  { %1424 = vmatmul.mubr.msk.bf16.vlgmr.msra.gmra.mrb[24].mxu1 %vm225_vm3, %v783_v44 }
 0xa6d   :  { %1437 = vmatprep.mubr.msk.bf16.mxu1 %vm1562_vm0, %v1561_v0  ;;  %1434 = vmatpush3.bf16.msra.mxu1 %v1476_v55 }
 0xa6e   :  { %1435 = vmatprep.subr.bf16.mxu1 %v1561_v0 }
 0xa71   :  { %1436 = vmatpush3.bf16.msra.mxu1 %v1477_v21 }
 0xb3b   :  { %v826_v46 = vpop.f32.mrb[20].mxu0 }
 0xb3c   :  { %v1419_v47 = vpop.f32.mrb[21].mxu0 }
 0xb3d   :  { %v829_v48 = vpop.f32.mrb[22].mxu0 }
 0xb3e   :  { %v1420_v49 = vpop.f32.mrb[23].mxu0 }
 0xb3f   :  { %v874_v50 = vpop.f32.mrb[24].mxu1 }
 0xb40   :  { %v880_v51 = vpack.c.bf16 %v874_v50, %v826_v46  ;;  %v1425_v52 = vpop.f32.mrb[25].mxu1 }
 0xb41   :  { %v877_v53 = vpop.f32.mrb[26].mxu1 }
 0xb42   :  { %v1426_v54 = vpop.f32.mrb[27].mxu1  ;;  %1430 = vmatmul.mubr.msk.bf16.vlgmr.msra.gmra.mrb[24].mxu0 %vm129_vm2, %v880_v51 }
 0xb43   :  { %1449 = vmatprep.mubr.msk.bf16.mxu0 %vm1562_vm0, %v1561_v0  ;;  %1442 = vmatpush3.bf16.msra.mxu0 %v1478_v8 }
 0xb44   :  { %1443 = vmatprep.subr.bf16.mxu0 %v1561_v0 }
 0xb47   :  { %1444 = vmatpush3.bf16.msra.mxu0 %v1479_v9 }
 0xb48   :  { %1445 = vmatprep.subr.bf16.mxu0 %v1561_v0 }
 0xc15   :  { %v933_v58 = vpop.f32.mrb[24].mxu0 }
 0xc16   :  { %v934_v61 = vadd.f32 %v933_v58, %v894_v57  ;;  %v1431_v62 = vpop.f32.mrb[25].mxu0 }
 0xc17   :  { %v936_v63 = vpop.f32.mrb[26].mxu0 }
 0xc18   :  { %v937_v1 = vadd.f32 %v936_v63, %v894_v57  ;;  %v1432_v2 = vpop.f32.mrb[27].mxu0  ;;  %v940_v5 = vadd.f32 %v934_v61, %v1767_v59  ;;  %v1480_v59 = vld [vmem:[%s1902_s8 + $0x10] sm:$0xff]  }
 0xc19   :  { %1446 = vmatpush3.bf16.msra.mxu0 %v1480_v59 }
 0xc1a   :  { %v941_v6 = vadd.f32 %v937_v1, %v1770_v60  ;;  %v1481_v60 = vld [vmem:[%s1902_s8 + $0x18] sm:$0xff]   ;;  %1447 = vmatprep.subr.bf16.mxu0 %v1561_v0 }
 0xc1c   :  { %v946_v7 = vpack.c.bf16 %v941_v6, %v940_v5 }
 0xc1d   :  { %1448 = vmatpush3.bf16.msra.mxu0 %v1481_v60 }
 0xc1e   :  { %1438 = vmatmul.mubr.msk.bf16.vlgmr.msra.gmra.mrb[28].mxu1 %vm79_vm1, %v946_v7 }
 0xcf1   :  { %v1003_v10 = vpop.f32.mrb[28].mxu1 }
 0xcf2   :  { %v1004_v11 = vadd.f32 %v1824_v56, %v1003_v10  ;;  %v1439_v12 = vpop.f32.mrb[29].mxu1 }
 0xcf3   :  { %v1006_v13 = vpop.f32.mrb[30].mxu1 }
 0xcf4   :  { %v1012_v14 = vmul.f32 0.044715, %v1004_v11  ;;  %v1007_v15 = vadd.f32 %v1824_v56, %v1006_v13  ;;  %v1440_v16 = vpop.f32.mrb[31].mxu1  ;;  %v1010_v27 = vmul.f32 0.5, %v1004_v11 }
 0xcf6   :  { %v1014_v17 = vmul.f32 %v1012_v14, %v1004_v11  ;;  %v1013_v18 = vmul.f32 0.044715, %v1007_v15  ;;  %v1011_v28 = vmul.f32 0.5, %v1007_v15 }
 0xcf8   :  { %v1016_v19 = vmul.f32 %v1014_v17, %v1004_v11  ;;  %v1015_v3 = vmul.f32 %v1013_v18, %v1007_v15 }
 0xcfa   :  { %v1018_v4 = vadd.f32 %v1016_v19, %v1004_v11  ;;  %v1017_v20 = vmul.f32 %v1015_v3, %v1007_v15 }
 0xcfc   :  { %v1020_v22 = vmul.f32 0.7978846, %v1018_v4  ;;  %v1019_v23 = vadd.f32 %v1017_v20, %v1007_v15 }
 0xcfe   :  { %1502 = vtanh.f32 %v1020_v22  ;;  %v1021_v0 = vmul.f32 0.7978846, %v1019_v23 }
 0xd00   :  { %1504 = vtanh.f32 %v1021_v0 }
 0xd08   :  { %v1503_v24 = vpop.eup %1502 }
 0xd09   :  { %v1024_v25 = vadd.f32 1.0, %v1503_v24 }
 0xd0a   :  { %v1505_v26 = vpop.eup %1504 }
 0xd0b   :  { %v1025_v29 = vadd.f32 1.0, %v1505_v26  ;;  %v1026_v30 = vmul.f32 %v1024_v25, %v1010_v27 }
 0xd0d   :  { %v1027_v31 = vmul.f32 %v1025_v29, %v1011_v28 }
 0xd0f   :  { %v1036_v32 = vpack.c.bf16 %v1027_v31, %v1026_v30 }
 0xd11   :  { %1450 = vmatmul.mubr.msk.bf16.vlgmr.msra.gmra.mrb[28].mxu0 %vm547_vm6, %v1036_v32 }
 0xde4   :  { %v1101_v34 = vpop.f32.mrb[28].mxu0 }
 0xde5   :  { %v1102_v35 = vadd.f32 %v1101_v34, %v1062_v33  ;;  %v1451_v36 = vpop.f32.mrb[29].mxu0 }
 0xde6   :  { %v1104_v37 = vpop.f32.mrb[30].mxu0 }
 0xde7   :  { %v1105_v38 = vadd.f32 %v1104_v37, %v1062_v33  ;;  %v1452_v39 = vpop.f32.mrb[31].mxu0  ;;  %v1108_v40 = vadd.f32 %v1102_v35, %v940_v5  ;;  %v1293_v5 = vld [vmem:[%s1903_s9 + $0x3] ss:$0 sm:$0xff]  ;;  %s1568_s9 = smov [#allocation5]  }
 0xde9   :  { %v1110_v41 = vsel %vm79_vm1, %v1108_v40, 0.0  ;;  %v1109_v42 = vadd.f32 %v1105_v38, %v941_v6 }
 0xdea   :  { %1111 = vadd.xlane.f32.xlu0 %v1110_v41 }
 0xdeb   :  { %v1113_v43 = vsel %vm79_vm1, %v1109_v42, 0.0 }
 0xdec   :  { %1114 = vadd.xlane.f32.xlu1 %v1113_v43 }
 0xe77   :  { %v1112_v44 = vpop.xlane.xlu0 %1111 }
 0xe78   :  { %v1117_v45 = vmul.f32 0.03125, %v1112_v44 }
 0xe79   :  { %v1115_v46 = vpop.xlane.xlu1 %1114 }
 0xe7a   :  { %v1119_v47 = vsub.f32 %v1108_v40, %v1117_v45  ;;  %v1118_v48 = vmul.f32 0.03125, %v1115_v46 }
 0xe7c   :  { %v1120_v49 = vsub.f32 %v1109_v42, %v1118_v48  ;;  %v1121_v50 = vmul.f32 %v1119_v47, %v1119_v47 }
 0xe7e   :  { %v1123_v51 = vsel %vm79_vm1, %v1121_v50, 0.0  ;;  %v1122_v52 = vmul.f32 %v1120_v49, %v1120_v49 }
 0xe7f   :  { %1124 = vadd.xlane.f32.xlu1 %v1123_v51 }
 0xe80   :  { %v1126_v53 = vsel %vm79_vm1, %v1122_v52, 0.0 }
 0xe81   :  { %1127 = vadd.xlane.f32.xlu0 %v1126_v53 }
 0xe97   :  { %1137 = vrot.lane.b32.xlu0 %v1824_v56, %s1567_s16 }
 0xf0c   :  { %v1125_v54 = vpop.xlane.xlu1 %1124 }
 0xf0d   :  { %v1129_v55 = vmul.f32 0.03125, %v1125_v54 }
 0xf0e   :  { %v1128_v21 = vpop.xlane.xlu0 %1127 }
 0xf0f   :  { %v1131_v57 = vadd.f32 1e-05, %v1129_v55  ;;  %v1130_v58 = vmul.f32 0.03125, %v1128_v21 }
 0xf11   :  { %1506 = vrsqrt.f32 %v1131_v57  ;;  %v1132_v61 = vadd.f32 1e-05, %v1130_v58 }
 0xf12   :  { %v1138_v63 = vpop.permute.xlu0 %1137 }
 0xf13   :  { %1508 = vrsqrt.f32 %v1132_v61 }
 0xf1b   :  { %v1507_v62 = vpop.eup %1506 }
 0xf1c   :  { %v1135_v1 = vmul.f32 %v1507_v62, %v1119_v47 }
 0xf1d   :  { %v1509_v2 = vpop.eup %1508 }
 0xf1e   :  { %v1136_v6 = vmul.f32 %v1509_v2, %v1120_v49  ;;  %v1140_v7 = vmul.f32 %v1138_v63, %v1135_v1 }
 0xf20   :  { %v1149_v8 = vadd.f32 %v1293_v5, %v1140_v7  ;;  %v1141_v56 = vmul.f32 %v1138_v63, %v1136_v6 }
 0xf22   :  { %v1166_v9 = vrot.slane %v1149_v8, 5  ;;  %v1152_v59 = vrot.slane %v1149_v8, 1  ;;  %v1150_v60 = vadd.f32 %v1293_v5, %v1141_v56  ;;  %v1170_v10 = vrot.slane %v1149_v8, 6 }
 0xf23   :  { %v1156_v11 = vrot.slane %v1149_v8, 2  ;;  %v1160_v17 = vrot.slane %v1149_v8, 3  ;;  %v1174_v19 = vrot.slane %v1149_v8, 7  ;;  %v1164_v34 = vrot.slane %v1149_v8, 4 }
 0xf24   :  { %1167 = vrot.lane.b32.xlu1 %v1166_v9, %s1567_s16  ;;  %1153 = vrot.lane.b32.xlu0 %v1152_v59, %s1567_s16  ;;  %v1186_v12 = vrot.slane %v1150_v60, 1  ;;  %v1190_v13 = vrot.slane %v1150_v60, 2  ;;  %v1200_v14 = vrot.slane %v1150_v60, 5  ;;  %v1194_v15 = vrot.slane %v1150_v60, 3 }
 0xf25   :  { %v1204_v16 = vrot.slane %v1150_v60, 6  ;;  %v1208_v18 = vrot.slane %v1150_v60, 7  ;;  %v1198_v28 = vrot.slane %v1150_v60, 4 }
 0xf28   :  { %1171 = vrot.lane.b32.xlu1 %v1170_v10, %s1559_s23  ;;  %1157 = vrot.lane.b32.xlu0 %v1156_v11, %s1559_s23 }
 0xf2c   :  { %1187 = vrot.lane.b32.xlu1 %v1186_v12, %s1567_s16  ;;  %1191 = vrot.lane.b32.xlu0 %v1190_v13, %s1559_s23 }
 0xf30   :  { %1201 = vrot.lane.b32.xlu1 %v1200_v14, %s1567_s16  ;;  %1195 = vrot.lane.b32.xlu0 %v1194_v15, %s1564_s15 }
 0xf34   :  { %1205 = vrot.lane.b32.xlu1 %v1204_v16, %s1559_s23  ;;  %1161 = vrot.lane.b32.xlu0 %v1160_v17, %s1564_s15  ;;  %s1245_s23 = sshll.u32 %s1568_s9, 4  ;;  %s1246_s23 = int_to_ptr.vmem [resolvable:$true] %s1245_s23 }
 0xf35   :  { %p1537_p9 = scmp.lt.s32.totalorder %s1246_s23, %s1246_s23 }
 0xf38   :  { %1209 = vrot.lane.b32.xlu1 %v1208_v18, %s1564_s15 }
 0xf3c   :  { %1175 = vrot.lane.b32.xlu1 %v1174_v19, %s1564_s15  ;;  %s1532_s15 = scalar_lea.vmem %s1246_s23, 64 }
 0xf3d   :  { %p1533_p8 = scmp.ne.s32.totalorder %s1246_s23, %s1532_s15  ;;  %p1538_p10 = scmp.lt.s32.totalorder %s1532_s15, %s1532_s15 }
 0xf3f   :  { %p1539_p11 = por %p1538_p10, %p1537_p9 }
 0xf41   :  { %p1540_p12 = pnand %p1539_p11, %p1533_p8 }
 0xf96   :  { %v1168_v3 = vpop.permute.xlu1 %1167  ;;  %v1154_v4 = vpop.permute.xlu0 %1153 }
 0xf97   :  { %v1178_v35 = vsel %vm79_vm1, %v1149_v8, %v1154_v4  ;;  %v1182_v39 = vsel %vm79_vm1, %v1164_v34, %v1168_v3 }
 0xf9a   :  { %v1172_v20 = vpop.permute.xlu1 %1171  ;;  %v1158_v22 = vpop.permute.xlu0 %1157 }
 0xf9b   :  { %v1179_v38 = vsel %vm547_vm6, %v1178_v35, %v1158_v22  ;;  %v1183_v41 = vsel %vm547_vm6, %v1182_v39, %v1172_v20 }
 0xf9e   :  { %v1188_v23 = vpop.permute.xlu1 %1187  ;;  %v1192_v0 = vpop.permute.xlu0 %1191 }
 0xf9f   :  { %v1212_v27 = vsel %vm79_vm1, %v1150_v60, %v1188_v23 }
 0xfa0   :  { %v1213_v30 = vsel %vm547_vm6, %v1212_v27, %v1192_v0 }
 0xfa2   :  { %v1202_v24 = vpop.permute.xlu1 %1201  ;;  %v1196_v25 = vpop.permute.xlu0 %1195 }
 0xfa3   :  { %v1215_v29 = vsel %vm79_vm1, %v1198_v28, %v1202_v24  ;;  %v1214_v36 = vsel %vm1180_vm7, %v1213_v30, %v1196_v25 }
 0xfa4   :  { %v1220_v42 = vrot.slane %v1214_v36, 7 }
 0xfa6   :  { %v1206_v26 = vpop.permute.xlu1 %1205  ;;  %v1162_v32 = vpop.permute.xlu0 %1161 }
 0xfa7   :  { %v1216_v31 = vsel %vm547_vm6, %v1215_v29, %v1206_v26  ;;  %v1181_v40 = vsel %vm1180_vm7, %v1179_v38, %v1162_v32 }
 0xfa8   :  { %v1225_v46 = vsel %vm1224_vm8, %v1181_v40, %v1220_v42 }
 0xfaa   :  { %v1210_v33 = vpop.permute.xlu1 %1209 }
 0xfab   :  { %v1217_v37 = vsel %vm1180_vm7, %v1216_v31, %v1210_v33 }
 0xfac   :  { %v1221_v43 = vrot.slane %v1217_v37, 7 }
 0xfae   :  { %v1176_v44 = vpop.permute.xlu1 %1175 }
 0xfaf   :  { %v1184_v45 = vsel %vm1180_vm7, %v1183_v41, %v1176_v44 }
 0xfb0   :  { %v1226_v47 = vsel %vm1224_vm8, %v1184_v45, %v1221_v43 }
 0xfb1   :  { %v1229_v48 = vcombine.low %v1225_v46, %v1226_v47 }
 0xfb3   :  { %1294 = vst.sshfl [vmem:[#allocation5] sm:$0x33 pattern:$0x76325410] %v1229_v48 }
 0xfb4   :  { %1543 = shalt.err (!%p1540_p12)
}
 0xfb5   :  { %s1544_s11 = scalar_lea.hbm %s1904_s10, 64 }
 0xfb6   :  { %p1545_p13 = scmp.ne.s32.totalorder %s1904_s10, %s1544_s11  ;;  %p1548_p0 = scmp.lt.u32.totalorder %s1544_s11, %s1904_s10 }
 0xfb8   :  { %p1550_p1 = pnand %p1548_p0, %p1545_p13 }
 0xfba   :  { %1553 = shalt.err (!%p1550_p1)
}
 0xfbb   :  { %1248 = dma.vmem_to_hbm [thread:$0]  %s1246_s23, 64, %s1904_s10, [#allocation4]  }
 0xfbc   :  { %1556 = dma.done.wait [#allocation4], 64  }
 0xfbd   :  { %1557 = vsyncadd [#allocation4], 4294967232 }
 0xfbe   :  { %1252 = vsyncpa [#allocation3], 1 }
 0xfbf   :  { %1253 = vsyncpa [#allocation4], 1 }

</bundles_post_ra>
